<compile_context>
chip_gen: v6e
topology: v6e:2x2x1
jax: 0.10.0
libtpu: 0.0.40
codegen_flags: <defaults>
</compile_context>

<pallas_src>
import functools

import jax
import jax.numpy as jnp
from jax import lax
from jax.experimental import pallas as pl
from jax.experimental.pallas import tpu as pltpu


def _cdiv(a, b):
    return -(-a // b)


def _round_up(a, b):
    return _cdiv(a, b) * b


def _tpu_generation():
    try:
        kind = jax.devices()[0].device_kind.lower()
    except Exception:
        return "unknown"
    if "v5 lite" in kind or "v5e" in kind or "v5lite" in kind:
        return "v5e"
    if "v6" in kind:
        return "v6e"
    if "v7" in kind or "7x" in kind:
        return "v7x"
    return "unknown"


def _hfpe_kernel(coords_ref, tables_ref, out_ref, *, m_pad, levels, onehot_dtype):
    # coords_ref: (TB, L)   int32   batch tile of hierarchical indices
    # tables_ref: (K, D)    table dtype, K = levels_avail * m_pad, D lane-dense
    # out_ref:    (TB, D)   f32
    tb = coords_ref.shape[0]
    k_dim = tables_ref.shape[0]

    if m_pad % 128 == 0:
        # Large tables: per-level lane-aligned slabs -> L*TB*m_pad compares total.
        iota = lax.broadcasted_iota(jnp.int32, (tb, m_pad), 1)
        slabs = [(iota == coords_ref[:, lvl:lvl + 1]).astype(onehot_dtype)
                 for lvl in range(levels)]
        if k_dim > levels * m_pad:  # coords supplies fewer levels than tables
            slabs.append(jnp.zeros((tb, k_dim - levels * m_pad), onehot_dtype))
        onehot = jnp.concatenate(slabs, axis=1)           # (TB, K)
    else:
        # Small m_pad: full-K compares; no zeros-init, no extra add/cast.
        iota = lax.broadcasted_iota(jnp.int32, (tb, k_dim), 1)
        onehot = (iota == coords_ref[:, 0:1]).astype(onehot_dtype)
        for lvl in range(1, levels):  # static, tiny unroll (L ~ 3)
            onehot = onehot + (
                iota == (coords_ref[:, lvl:lvl + 1] + lvl * m_pad)
            ).astype(onehot_dtype)

    # One MXU gather for all levels: (TB, K) @ (K, D), f32 accumulate.
    out_ref[...] = jnp.dot(
        onehot.astype(tables_ref.dtype), tables_ref[...],
        preferred_element_type=jnp.float32).astype(out_ref.dtype)


def hierarchi_feature_positional_encoding(coords, tables_flat, m_pad, d_emb=None):
    """coords: (B, L) int; tables_flat: (levels*m_pad, d_pad) pre-padded slab
    from make_params.  Returns (B, d_emb) float32."""
    coords = coords.astype(jnp.int32)
    B, L = coords.shape
    K, d_pad = tables_flat.shape
    assert d_pad % 128 == 0, "tables_flat must come from make_params (lane-padded)"
    levels_avail = K // m_pad
    assert L <= levels_avail, "coords has more levels than embedding tables"
    if d_emb is None:
        d_emb = d_pad

    gen = _tpu_generation()

    # --- batch tile: generation-sized, right-sized to minimize padding. ---
    if gen in ("v6e", "v7x") and B >= 256:
        tb_max = 256                       # fill the 256-wide MXU rows
    else:
        tb_max = 128                       # v5e MXU is 128-wide; also small-B default
    target_tiles = max(1, _cdiv(B, tb_max))
    if gen == "v7x" and B > 8:
        target_tiles = max(2, target_tiles)  # keep both v7x TensorCores busy
    tb_eff = max(8, _round_up(_cdiv(B, target_tiles), 8))
    num_tiles = _cdiv(B, tb_eff)
    b_pad = num_tiles * tb_eff
    if b_pad != B:
        # Padded rows use index 0 (a valid row); their outputs are sliced off.
        coords = jnp.pad(coords, ((0, b_pad - B), (0, 0)))

    # --- one-hot dtype: table dtype, except f32 on v5e (no bf16 VPU path). ---
    tab_dtype = tables_flat.dtype
    if gen == "v5e" and tab_dtype != jnp.float32:
        onehot_dtype = jnp.float32
    else:
        onehot_dtype = tab_dtype

    # --- table slab buffering: single-buffer once VMEM residency matters. ---
    tab_itemsize = jnp.dtype(tab_dtype).itemsize
    table_bytes = K * d_pad * tab_itemsize
    single_buffer_table = table_bytes > (1 << 21)          # > 2 MiB
    table_spec_kwargs = (
        dict(pipeline_mode=pl.Buffered(1)) if single_buffer_table else {})

    # --- VMEM budget: pipelined blocks + in-kernel (TB, K) intermediates. ---
    oh_itemsize = jnp.dtype(onehot_dtype).itemsize
    n_table_bufs = 1 if single_buffer_table else 2
    vmem_bytes = (2 * tb_eff * L * 4                        # coords tiles (x2)
                  + n_table_bufs * table_bytes              # grid-invariant slab
                  + 2 * tb_eff * d_pad * 4                  # f32 output tiles (x2)
                  + tb_eff * K * (4 + 2 * oh_itemsize))     # iota + one-hot temps
    vmem_cap = {"v7x": 48 << 20, "v6e": 100 << 20, "v5e": 100 << 20}.get(gen, 64 << 20)
    vmem_limit = int(min(max(int(1.5 * vmem_bytes), 32 << 20), vmem_cap))
    # TODO(synk): for table slabs exceeding the single-buffered VMEM budget (esp.
    # v7x 64 MiB), add an 'arbitrary' K-chunk grid axis with an f32 accumulator
    # scratch (init/finalize via pl.when) instead of relying on the vmem limit.

    kernel = functools.partial(_hfpe_kernel, m_pad=m_pad, levels=L,
                               onehot_dtype=onehot_dtype)
    out = pl.pallas_call(
        kernel,
        out_shape=jax.ShapeDtypeStruct((b_pad, d_pad), jnp.float32),
        grid_spec=pltpu.PrefetchScalarGridSpec(
            num_scalar_prefetch=0,
            grid=(num_tiles,),
            in_specs=[
                # Coords batch tile.
                pl.BlockSpec((tb_eff, L), lambda i: (i, 0)),
                # Full flat table slab; constant index_map -> fetched once per core.
                pl.BlockSpec((K, d_pad), lambda i: (0, 0), **table_spec_kwargs),
            ],
            out_specs=pl.BlockSpec((tb_eff, d_pad), lambda i: (i, 0)),
        ),
        compiler_params=pltpu.CompilerParams(
            dimension_semantics=("parallel",),
            vmem_limit_bytes=vmem_limit,
        ),
    )(coords, tables_flat)
    return out[:B, :d_emb]


def make_params(max_branches, d_emb, key, dtype=jnp.float32):
    """One-time prep: per-level embedding tables padded to m_pad rows (sublane
    multiple for `dtype`) and d_emb padded to a multiple of 128, concatenated to
    a single (levels*m_pad, d_pad) slab.  Unused rows/cols are zero."""
    levels = len(max_branches)
    itemsize = jnp.dtype(dtype).itemsize
    row_align = {4: 8, 2: 16, 1: 32}.get(itemsize, 8)
    m_pad = max(row_align, _round_up(max(max_branches), row_align))
    d_pad = _round_up(d_emb, 128)
    keys = jax.random.split(key, levels)
    rows = []
    for i in range(levels):
        t = jax.random.normal(keys[i], (max_branches[i], d_emb), jnp.float32)
        t = jnp.pad(t, ((0, m_pad - max_branches[i]), (0, d_pad - d_emb)))
        rows.append(t)
    return jnp.concatenate(rows, axis=0).astype(dtype), m_pad


def reference(coords, tables_flat, m_pad, d_emb):
    """Pure-JAX reference of the PyTorch forward (sum of per-level embeddings)."""
    B, L = coords.shape
    out = jnp.zeros((B, d_emb), jnp.float32)
    for i in range(L):
        tbl = tables_flat[i * m_pad:(i + 1) * m_pad, :d_emb].astype(jnp.float32)
        out = out + jnp.take(tbl, coords[:, i], axis=0)
    return out


if __name__ == "__main__":
    max_branches = (4, 6, 5)     # module __init__ arg
    d_emb = 32
    B = 20                       # deliberately not a multiple of 8

    key = jax.random.PRNGKey(0)
    k_tab, *k_coords = jax.random.split(key, 1 + len(max_branches))

    # (levels*m_pad, d_pad) pre-padded slab; padding happens once, not per call.
    tables_flat, m_pad = make_params(max_branches, d_emb, k_tab)

    # coords[:, i] in [0, max_branches[i])
    cols = [jax.random.randint(k_coords[i], (B, 1), 0, max_branches[i], jnp.int32)
            for i in range(len(max_branches))]
    coords = jnp.concatenate(cols, axis=1)                  # (B, L) int32

    out = hierarchi_feature_positional_encoding(coords, tables_flat, m_pad, d_emb)
    out = jax.block_until_ready(out)

    ref = reference(coords, tables_flat, m_pad, d_emb)
    assert out.shape == (B, d_emb)
    assert jnp.allclose(out, ref, atol=1e-5, rtol=1e-5), "mismatch vs reference"
    print("KERNEL_OK")
</pallas_src>

<mosaic_0001>
module attributes {stable_mosaic.version = 11 : i64} {
  func.func @_hfpe_kernel(%arg0: i32, %arg1: memref<24x3xi32, #tpu.memory_space<vmem>>, %arg2: memref<24x128xf32, #tpu.memory_space<vmem>>, %arg3: memref<24x128xf32, #tpu.memory_space<vmem>>) attributes {dimension_semantics = [#tpu.dimension_semantics<parallel>], iteration_bounds = array<i64: 1>, scalar_prefetch = 0 : i64, scratch_operands = 0 : i64, tpu.core_type = #tpu.core_type<tc>, window_params = [{transform_indices = @transform_0, window_bounds = array<i64: 24, 3>}, {pipeline_mode = #tpu.pipeline_mode<synchronous>, transform_indices = @transform_1, window_bounds = array<i64: 24, 128>}, {transform_indices = @transform_2, window_bounds = array<i64: 24, 128>}]} {
    %0 = tpu.iota {dimensions = array<i32: 1>} : vector<24x24xi32>
    %c0 = arith.constant 0 : index
    %c0_0 = arith.constant 0 : index
    %1 = vector.load %arg1[%c0, %c0_0] : memref<24x3xi32, #tpu.memory_space<vmem>>, vector<24x1xi32>
    %2 = vector.broadcast %1 : vector<24x1xi32> to vector<24x24xi32>
    %3 = arith.cmpi eq, %0, %2 : vector<24x24xi32>
    %4 = arith.extui %3 : vector<24x24xi1> to vector<24x24xi32>
    %5 = arith.sitofp %4 : vector<24x24xi32> to vector<24x24xf32>
    %c0_1 = arith.constant 0 : index
    %c1 = arith.constant 1 : index
    %6 = vector.load %arg1[%c0_1, %c1] : memref<24x3xi32, #tpu.memory_space<vmem>>, vector<24x1xi32>
    %c8_i32 = arith.constant 8 : i32
    %7 = vector.broadcast %c8_i32 : i32 to vector<24x1xi32>
    %8 = arith.addi %6, %7 : vector<24x1xi32>
    %9 = vector.broadcast %8 : vector<24x1xi32> to vector<24x24xi32>
    %10 = arith.cmpi eq, %0, %9 : vector<24x24xi32>
    %11 = arith.extui %10 : vector<24x24xi1> to vector<24x24xi32>
    %12 = arith.sitofp %11 : vector<24x24xi32> to vector<24x24xf32>
    %13 = arith.addf %5, %12 : vector<24x24xf32>
    %c0_2 = arith.constant 0 : index
    %c2 = arith.constant 2 : index
    %14 = vector.load %arg1[%c0_2, %c2] : memref<24x3xi32, #tpu.memory_space<vmem>>, vector<24x1xi32>
    %c16_i32 = arith.constant 16 : i32
    %15 = vector.broadcast %c16_i32 : i32 to vector<24x1xi32>
    %16 = arith.addi %14, %15 : vector<24x1xi32>
    %17 = vector.broadcast %16 : vector<24x1xi32> to vector<24x24xi32>
    %18 = arith.cmpi eq, %0, %17 : vector<24x24xi32>
    %19 = arith.extui %18 : vector<24x24xi1> to vector<24x24xi32>
    %20 = arith.sitofp %19 : vector<24x24xi32> to vector<24x24xf32>
    %21 = arith.addf %13, %20 : vector<24x24xf32>
    %c0_3 = arith.constant 0 : index
    %c0_4 = arith.constant 0 : index
    %22 = vector.load %arg2[%c0_3, %c0_4] : memref<24x128xf32, #tpu.memory_space<vmem>>, vector<24x128xf32>
    %cst = arith.constant dense<0.000000e+00> : vector<24x128xf32>
    %23 = tpu.matmul %21, %22, %cst {dimension_numbers = #tpu.dot_dimension_numbers<[1], [0], [0], [1], [0, 0, 1, 1], [], []>} : vector<24x24xf32>, vector<24x128xf32>, vector<24x128xf32> -> vector<24x128xf32>
    %c0_5 = arith.constant 0 : index
    %c0_6 = arith.constant 0 : index
    %24 = vector.load %arg3[%c0_5, %c0_6] : memref<24x128xf32, #tpu.memory_space<vmem>>, vector<24x128xf32>
    tpu.vector_store %arg3[%c0_5, %c0_6], %23 {strides = array<i32>} : memref<24x128xf32, #tpu.memory_space<vmem>>, vector<24x128xf32>,
    return
  }
  func.func @transform_0(%arg0: i32) -> (i32, i32) {
    %c0_i32 = arith.constant 0 : i32
    %c0_i32_0 = arith.constant 0 : i32
    return %arg0, %c0_i32 : i32, i32
  }
  func.func @transform_1(%arg0: i32) -> (i32, i32) {
    %c0_i32 = arith.constant 0 : i32
    %c0_i32_0 = arith.constant 0 : i32
    %c0_i32_1 = arith.constant 0 : i32
    return %c0_i32, %c0_i32_0 : i32, i32
  }
  func.func @transform_2(%arg0: i32) -> (i32, i32) {
    %c0_i32 = arith.constant 0 : i32
    %c0_i32_0 = arith.constant 0 : i32
    return %arg0, %c0_i32 : i32, i32
  }
}

</mosaic_0001>

<bundles_post_ra>
// kernel: tpu_custom_call.1
= control target key start
LH: loop header
LB: loop body
LE: loop exit
PB: predicated region body
PF: predicated region fallthrough
CT: control target
= control target key end

     0   :  { %v271_v1 = vmov 0   ;;  %v272_v2 = vmov 2   ;;  %s339_s0 = inlined_call_operand.vmem [shape: s32[24,3], index: 0, kind: input, shape index: {}]   ;;  %s340_s1 = inlined_call_operand.vmem [shape: f32[24,128], index: 1, kind: input, shape index: {}]   ;;  %s341_s2 = inlined_call_operand.hbm [shape: f32[24,128], index: 2, kind: output, shape index: {}]  }
   0x1   :  { %v15_v0 = vld [vmem:[%s339_s0 + $0x8] sm:$0xff]  ;;  %242 = vset.pattern.permute.xlu0 %v271_v1  ;;  %244 = vset.pattern.permute.xlu1 %v272_v2 }
   0x2   :  { %v60_v3 = vadd.s32 16, %v15_v0 }
   0x3   :  { %7 = vsyncpa [#allocation3], 0  ;;  %21 = vperm.xlu0 %242, %v15_v0   ;;  %v36_v4 = vadd.s32 8, %v15_v0  ;;  %v273_v5 = vmov 0.0   ;;  %v85_v6 = vld [vmem:[%s340_s1 + $0x10] sm:$0xff]  ;;  %v14_v7 = vld [vmem:[%s339_s0] sm:$0xff]  ;;  %v12_v16 = vlaneseq }
   0x4   :  { %66 = vperm.xlu1 %244, %v60_v3   ;;  %228 = vmatprep.subr.mxu1 %v273_v5  ;;  %v84_v8 = vld [vmem:[%s340_s1 + $0x8] sm:$0xff]  ;;  %v274_v9 = vmov 1   ;;  %v35_v10 = vadd.s32 8, %v14_v7  ;;  %v83_v11 = vld [vmem:[%s340_s1] sm:$0xff]  ;;  %v16_v12 = vld [vmem:[%s339_s0 + $0x10] sm:$0xff]  ;;  %vm275_vm0 = vmmov 0  }
   0x5   :  { %231 = vmatpush3.msra.mxu1 %v85_v6  ;;  %213 = vmatprep.subr.mxu0 %v273_v5  ;;  %v59_v13 = vadd.s32 16, %v14_v7  ;;  %v37_v14 = vadd.s32 8, %v16_v12  ;;  %v61_v15 = vadd.s32 16, %v16_v12  ;;  %v13_v18 = vand.u32 127, %v12_v16  ;;  %s276_s0 = smov [#allocation2]  }
   0x6   :  { %229 = vmatprep.subr.mxu1 %v273_v5  ;;  %214 = vmatpush3.msra.mxu0 %v85_v6  ;;  %vm86_vm4 = vcmask 195584   ;;  %s184_s1 = sshll.u32 %s276_s0, 4  ;;  %s185_s1 = int_to_ptr.vmem [resolvable:$true] %s184_s1 }
   0x7   :  { %243 = vset.pattern.permute.xlu0 %v274_v9  ;;  %232 = vmatpush3.msra.mxu1 %v84_v8  ;;  %s249_s21 = scalar_lea.vmem %s185_s1, 384  ;;  %p254_p1 = scmp.lt.s32.totalorder %s185_s1, %s185_s1 }
   0x8   :  { %245 = vset.pattern.permute.xlu1 %v271_v1  ;;  %42 = vperm.xlu0 %243, %v36_v4   ;;  %p250_p0 = scmp.ne.s32.totalorder %s185_s1, %s249_s21  ;;  %p255_p2 = scmp.lt.s32.totalorder %s249_s21, %s249_s21 }
   0x9   :  { %18 = vperm.xlu1 %245, %v14_v7   ;;  %230 = vmatprep.subr.mxu1 %v273_v5 }
   0xa   :  { %233 = vmatpush3.msra.mxu1 %v83_v11  ;;  %222 = vmatprep.mubr.msk.f32.mxu1 %vm275_vm0, %v273_v5  ;;  %p256_p3 = por %p255_p2, %p254_p1 }
   0xb   :  { %215 = vmatprep.subr.mxu0 %v273_v5  ;;  %219 = vmatprep.mubr.msk.f32.mxu0 %vm275_vm0, %v273_v5 }
   0xc   :  { %39 = vperm.xlu0 %243, %v35_v10   ;;  %216 = vmatpush3.msra.mxu0 %v84_v8  ;;  %p257_p4 = pnand %p256_p3, %p250_p0 }
   0xd   :  { %24 = vperm.xlu1 %245, %v16_v12   ;;  %217 = vmatprep.subr.mxu0 %v273_v5 }
   0xe   :  { %218 = vmatpush3.msra.mxu0 %v83_v11 }
  0x10   :  { %247 = vset.pattern.permute.xlu0 %v272_v2 }
  0x11   :  { %246 = vset.pattern.permute.xlu1 %v274_v9  ;;  %63 = vperm.xlu0 %247, %v59_v13  }
  0x12   :  { %45 = vperm.xlu1 %246, %v37_v14  }
  0x16   :  { %248 = vset.pattern.permute.xlu1 %v272_v2 }
  0x17   :  { %69 = vperm.xlu1 %248, %v61_v15  }
  0x7e   :  { %v22_v17 = vpop.permute.xlu0 %21 }
  0x7f   :  { %v67_v19 = vpop.permute.xlu1 %66  ;;  %vm27_vm1 = vcmp.eq.s32.totalorder %v13_v18, %v22_v17 }
  0x80   :  { %v196_v20 = vsel %vm27_vm1, 1.0, %v273_v5  ;;  %vm72_vm2 = vcmp.eq.s32.totalorder %v13_v18, %v67_v19 }
  0x81   :  { %v202_v25 = vsel %vm72_vm2, 1.0, %v273_v5 }
  0x83   :  { %v43_v21 = vpop.permute.xlu0 %42 }
  0x84   :  { %vm48_vm3 = vcmp.eq.s32.totalorder %v13_v18, %v43_v21  ;;  %v19_v22 = vpop.permute.xlu1 %18 }
  0x85   :  { %v199_v23 = vsel %vm48_vm3, 1.0, %v273_v5  ;;  %vm26_vm6 = vcmp.eq.s32.totalorder %v13_v18, %v19_v22 }
  0x86   :  { %v57_v24 = vadd.f32 %v199_v23, %v196_v20  ;;  %v195_v30 = vsel %vm26_vm6, 1.0, %v273_v5 }
  0x87   :  { %v40_v26 = vpop.permute.xlu0 %39 }
  0x88   :  { %v81_v27 = vadd.f32 %v202_v25, %v57_v24  ;;  %vm47_vm5 = vcmp.eq.s32.totalorder %v13_v18, %v40_v26  ;;  %v25_v28 = vpop.permute.xlu1 %24 }
  0x89   :  { %v198_v29 = vsel %vm47_vm5, 1.0, %v273_v5  ;;  %vm28_vm9 = vcmp.eq.s32.totalorder %v13_v18, %v25_v28 }
  0x8a   :  { %223 = vmatmul.mubr.msk.f32.vlgmr.msra.gmra.mxu1 %vm86_vm4, %v81_v27  ;;  %v56_v32 = vadd.f32 %v198_v29, %v195_v30  ;;  %v197_v37 = vsel %vm28_vm9, 1.0, %v273_v5 }
  0x8b   :  { %225 = vmatprep.mubr.msk.f32.mxu1 %vm275_vm0, %v273_v5 }
  0x8c   :  { %v64_v31 = vpop.permute.xlu0 %63 }
  0x8d   :  { %vm71_vm7 = vcmp.eq.s32.totalorder %v13_v18, %v64_v31  ;;  %v46_v33 = vpop.permute.xlu1 %45 }
  0x8e   :  { %v201_v34 = vsel %vm71_vm7, 1.0, %v273_v5  ;;  %vm49_vm8 = vcmp.eq.s32.totalorder %v13_v18, %v46_v33 }
  0x8f   :  { %v80_v35 = vadd.f32 %v201_v34, %v56_v32  ;;  %v200_v36 = vsel %vm49_vm8, 1.0, %v273_v5 }
  0x90   :  { %v58_v39 = vadd.f32 %v200_v36, %v197_v37 }
  0x91   :  { %220 = vmatmul.mubr.msk.f32.vlgmr.msra.gmra.mxu0 %vm86_vm4, %v80_v35 }
  0x92   :  { %v70_v38 = vpop.permute.xlu1 %69 }
  0x93   :  { %vm73_vm10 = vcmp.eq.s32.totalorder %v13_v18, %v70_v38 }
  0x94   :  { %v203_v40 = vsel %vm73_vm10, 1.0, %v273_v5 }
  0x95   :  { %v82_v41 = vadd.f32 %v203_v40, %v58_v39 }
  0x97   :  { %226 = vmatmul.mubr.msk.f32.gmra.mxu1 %vm86_vm4, %v82_v41 }
 0x14a   :  { %v167_v42 = vpop.f32.mrf.mxu1 }
 0x14b   :  { %177 = vst [vmem:[#allocation2 + $0x8] sm:$0xff] %v167_v42 }
 0x14c   :  { %v224_v43 = vpop.f32.mrf.mxu1 }
 0x151   :  { %v162_v44 = vpop.f32.mrf.mxu0 }
 0x152   :  { %176 = vst [vmem:[#allocation2] sm:$0xff] %v162_v44 }
 0x153   :  { %v221_v45 = vpop.f32.mrf.mxu0 }
 0x157   :  { %v172_v46 = vpop.f32.mrf.mxu1 }
 0x158   :  { %178 = vst [vmem:[#allocation2 + $0x10] sm:$0xff] %v172_v46 }
 0x159   :  { %v227_v47 = vpop.f32.mrf.mxu1 }
 0x15a   :  { %260 = shalt.err (!%p257_p4)
}
 0x15b   :  { %s277_s22 = smov 128   ;;  %s278_s23 = smov 8  }
 0x15c   :  { %190 = dma.vmem_to_hbm [thread:$0]  %s185_s1, 384, %s341_s2, [#allocation3], %s277_s22, %s277_s22, %s278_s23  }
 0x15d   :  { %269 = dma.done.wait [#allocation3], 384  }
 0x15e   :  { %270 = vsyncadd [#allocation3], 4294966912 }
 0x15f   :  { %194 = vsyncpa [#allocation3], 1 }

</bundles_post_ra>
